<compile_context>
chip_gen: v6e
topology: v6e:2x2x1
jax: 0.10.0
libtpu: 0.0.40
codegen_flags: <defaults>
</compile_context>

<pallas_src>
import math

import jax
import jax.numpy as jnp
from jax.experimental import pallas as pl
from jax.experimental.pallas import tpu as pltpu


def _logistic_kernel(x_ref, w_ref, b_ref, o_ref):
    # MXU matmul (bf16 inputs, f32 accumulate) + f32 broadcasted bias add (VPU).
    acc = jnp.dot(x_ref[...], w_ref[...], preferred_element_type=jnp.float32)
    o_ref[...] = (acc + b_ref[...]).astype(o_ref.dtype)


def mnist_logistic(
    xb: jax.Array,
    weights: jax.Array,
    bias: jax.Array,
    *,
    compute_dtype=jnp.bfloat16,
    tm: int | None = None,
) -> jax.Array:
    """Forward pass of Mnist_Logistic: xb @ weights + bias.

    xb:      (B, 784) float32
    weights: (784, 10) float32
    bias:    (10,) float32
    returns: (B, 10) float32
    """
    B, D = xb.shape
    Dw, C = weights.shape
    assert D == Dw

    # --- lane-dense class dim: pad C (10) -> 128 --------------------------
    C_PAD = 128
    assert C <= C_PAD
    w_p = (
        jnp.zeros((D, C_PAD), weights.dtype).at[:, :C].set(weights).astype(compute_dtype)
    )
    b_p = jnp.zeros((1, C_PAD), jnp.float32).at[:, :C].set(bias.astype(jnp.float32))

    # --- batch tiling ------------------------------------------------------
    if tm is None:
        # Round B up to a sublane multiple, cap at 1024 rows per tile
        # (safe under v7x's 32 MiB scoped VMEM with double buffering).
        tm = min(1024, ((B + 7) // 8) * 8)
    n_tiles = pl.cdiv(B, tm)
    B_pad = n_tiles * tm

    x = xb.astype(compute_dtype)
    if B_pad != B:
        x = jnp.zeros((B_pad, D), compute_dtype).at[:B].set(x)

    bytes_accessed = (
        B_pad * D * jnp.dtype(compute_dtype).itemsize       # x
        + D * C_PAD * jnp.dtype(compute_dtype).itemsize     # weights (resident)
        + C_PAD * 4                                         # bias
        + B_pad * C_PAD * 4                                 # output
    )

    out = pl.pallas_call(
        _logistic_kernel,
        out_shape=jax.ShapeDtypeStruct((B_pad, C_PAD), jnp.float32),
        grid_spec=pl.GridSpec(
            grid=(n_tiles,),
            in_specs=[
                pl.BlockSpec((tm, D), lambda i: (i, 0)),        # x: streamed by batch tile
                pl.BlockSpec((D, C_PAD), lambda i: (0, 0)),     # W: resident
                pl.BlockSpec((1, C_PAD), lambda i: (0, 0)),     # bias: resident
            ],
            out_specs=pl.BlockSpec((tm, C_PAD), lambda i: (i, 0)),
        ),
        compiler_params=pltpu.CompilerParams(
            dimension_semantics=("parallel",),
        ),
        cost_estimate=pl.CostEstimate(
            flops=2 * B_pad * D * C_PAD,
            transcendentals=0,
            bytes_accessed=bytes_accessed,
        ),
    )(x, w_p, b_p)

    # Strip batch / class padding.
    return out[:B, :C]


if __name__ == "__main__":
    bs = 64  # matches the module's bs = 64
    in_features = 784
    num_classes = 10

    key = jax.random.PRNGKey(0)
    kx, kw = jax.random.split(key)

    # Deterministic "parameters" mirroring __init__:
    #   weights = randn(784, 10) / sqrt(784); bias = zeros(10)
    weights = jax.random.normal(
        kw, (in_features, num_classes), dtype=jnp.float32
    ) / math.sqrt(in_features)
    bias = jnp.zeros((num_classes,), dtype=jnp.float32)

    xb = jax.random.normal(kx, (bs, in_features), dtype=jnp.float32)

    out = mnist_logistic(xb, weights, bias)
    out = jax.block_until_ready(out)
    assert out.shape == (bs, num_classes)
    assert out.dtype == jnp.float32

    # Reference with the same bf16 input precision (f32 accumulate), tight tol.
    ref_bf16 = (
        xb.astype(jnp.bfloat16).astype(jnp.float32)
        @ weights.astype(jnp.bfloat16).astype(jnp.float32)
        + bias
    )
    assert jnp.allclose(out, ref_bf16, atol=1e-3, rtol=1e-3)

    # Full-f32 reference, loose tol (bf16 input rounding only).
    ref_f32 = xb @ weights + bias
    assert jnp.allclose(out, ref_f32, atol=5e-2, rtol=5e-2)

    print("KERNEL_OK")
</pallas_src>

<mosaic_0001>
module attributes {stable_mosaic.version = 11 : i64} {
  func.func @_logistic_kernel(%arg0: i32, %arg1: memref<64x784xbf16, #tpu.memory_space<vmem>>, %arg2: memref<784x128xbf16, #tpu.memory_space<vmem>>, %arg3: memref<1x128xf32, #tpu.memory_space<vmem>>, %arg4: memref<64x128xf32, #tpu.memory_space<vmem>>) attributes {dimension_semantics = [#tpu.dimension_semantics<parallel>], iteration_bounds = array<i64: 1>, scalar_prefetch = 0 : i64, scratch_operands = 0 : i64, tpu.core_type = #tpu.core_type<tc>, window_params = [{transform_indices = @transform_0, window_bounds = array<i64: 64, 784>}, {pipeline_mode = #tpu.pipeline_mode<synchronous>, transform_indices = @transform_1, window_bounds = array<i64: 784, 128>}, {pipeline_mode = #tpu.pipeline_mode<synchronous>, transform_indices = @transform_2, window_bounds = array<i64: 1, 128>}, {transform_indices = @transform_3, window_bounds = array<i64: 64, 128>}]} {
    %c0 = arith.constant 0 : index
    %c0_0 = arith.constant 0 : index
    %0 = vector.load %arg1[%c0, %c0_0] : memref<64x784xbf16, #tpu.memory_space<vmem>>, vector<64x784xbf16>
    %c0_1 = arith.constant 0 : index
    %c0_2 = arith.constant 0 : index
    %1 = vector.load %arg2[%c0_1, %c0_2] : memref<784x128xbf16, #tpu.memory_space<vmem>>, vector<784x128xbf16>
    %cst = arith.constant dense<0.000000e+00> : vector<64x128xf32>
    %2 = tpu.matmul %0, %1, %cst {dimension_numbers = #tpu.dot_dimension_numbers<[1], [0], [0], [1], [0, 0, 1, 1], [], []>} : vector<64x784xbf16>, vector<784x128xbf16>, vector<64x128xf32> -> vector<64x128xf32>
    %c0_3 = arith.constant 0 : index
    %c0_4 = arith.constant 0 : index
    %3 = vector.load %arg3[%c0_3, %c0_4] : memref<1x128xf32, #tpu.memory_space<vmem>>, vector<1x128xf32>
    %4 = vector.broadcast %3 : vector<1x128xf32> to vector<64x128xf32>
    %5 = arith.addf %2, %4 : vector<64x128xf32>
    %c0_5 = arith.constant 0 : index
    %c0_6 = arith.constant 0 : index
    %6 = vector.load %arg4[%c0_5, %c0_6] : memref<64x128xf32, #tpu.memory_space<vmem>>, vector<64x128xf32>
    tpu.vector_store %arg4[%c0_5, %c0_6], %5 {strides = array<i32>} : memref<64x128xf32, #tpu.memory_space<vmem>>, vector<64x128xf32>,
    return
  }
  func.func @transform_0(%arg0: i32) -> (i32, i32) {
    %c0_i32 = arith.constant 0 : i32
    %c0_i32_0 = arith.constant 0 : i32
    return %arg0, %c0_i32 : i32, i32
  }
  func.func @transform_1(%arg0: i32) -> (i32, i32) {
    %c0_i32 = arith.constant 0 : i32
    %c0_i32_0 = arith.constant 0 : i32
    %c0_i32_1 = arith.constant 0 : i32
    return %c0_i32, %c0_i32_0 : i32, i32
  }
  func.func @transform_2(%arg0: i32) -> (i32, i32) {
    %c0_i32 = arith.constant 0 : i32
    %c0_i32_0 = arith.constant 0 : i32
    %c0_i32_1 = arith.constant 0 : i32
    return %c0_i32, %c0_i32_0 : i32, i32
  }
  func.func @transform_3(%arg0: i32) -> (i32, i32) {
    %c0_i32 = arith.constant 0 : i32
    %c0_i32_0 = arith.constant 0 : i32
    return %arg0, %c0_i32 : i32, i32
  }
}

</mosaic_0001>

<bundles_post_ra>
// kernel: tpu_custom_call.1
= control target key start
LH: loop header
LB: loop body
LE: loop exit
PB: predicated region body
PF: predicated region fallthrough
CT: control target
= control target key end

     0   :  { %8 = vsyncpa [#allocation3], 0  ;;  %s1372_s0 = inlined_call_operand.hbm [shape: bf16[64,784], index: 0, kind: input, shape index: {}]   ;;  %s1373_s1 = inlined_call_operand.hbm [shape: bf16[784,128], index: 1, kind: input, shape index: {}]   ;;  %s1374_s2 = inlined_call_operand.vmem [shape: f32[1,128], index: 2, kind: input, shape index: {}]   ;;  %s1375_s3 = inlined_call_operand.hbm [shape: f32[64,128], index: 3, kind: output, shape index: {}]  }
   0x1   :  { %9 = vsyncpa [#allocation6], 0 }
   0x2   :  { %10 = vsyncpa [#allocation4], 0  ;;  %s1311_s12 = smov [#allocation2]  }
   0x3   :  { %s16_s13 = sshll.u32 %s1311_s12, 4  ;;  %s17_s13 = int_to_ptr.vmem [resolvable:$true] %s16_s13 }
   0x4   :  { %s1253_s14 = scalar_lea.vmem %s17_s13, 3584  ;;  %p1258_p1 = scmp.lt.s32.totalorder %s17_s13, %s17_s13 }
   0x5   :  { %p1254_p0 = scmp.ne.s32.totalorder %s17_s13, %s1253_s14  ;;  %p1259_p2 = scmp.lt.s32.totalorder %s1253_s14, %s1253_s14 }
   0x7   :  { %p1260_p3 = por %p1259_p2, %p1258_p1 }
   0x9   :  { %p1261_p4 = pnand %p1260_p3, %p1254_p0 }
   0xb   :  { %1264 = shalt.err (!%p1261_p4)
}
   0xc   :  { %s1312_s15 = smov 448   ;;  %s1313_s16 = smov 28  }
   0xd   :  { %22 = dma.hbm_to_vmem [thread:$0]  %s1372_s0, 3584, %s17_s13, [#allocation3], %s1312_s15, %s1312_s15, %s1313_s16  }
   0xe   :  { %s1314_s19 = smov [#allocation5]  }
   0xf   :  { %s28_s20 = sshll.u32 %s1314_s19, 4  ;;  %s29_s20 = int_to_ptr.vmem [resolvable:$true] %s28_s20 }
  0x10   :  { %s1273_s21 = scalar_lea.vmem %s29_s20, 6272  ;;  %p1278_p6 = scmp.lt.s32.totalorder %s29_s20, %s29_s20 }
  0x11   :  { %p1274_p5 = scmp.ne.s32.totalorder %s29_s20, %s1273_s21  ;;  %p1279_p7 = scmp.lt.s32.totalorder %s1273_s21, %s1273_s21 }
  0x13   :  { %p1280_p8 = por %p1279_p7, %p1278_p6 }
  0x15   :  { %p1281_p9 = pnand %p1280_p8, %p1274_p5 }
  0x17   :  { %1284 = shalt.err (!%p1281_p9)
}
  0x18   :  { %s1315_s22 = smov 64   ;;  %s1316_s23 = smov 4  }
  0x19   :  { %34 = dma.hbm_to_vmem [thread:$0]  %s1373_s1, 6272, %s29_s20, [#allocation6], %s1315_s22, %s1315_s22, %s1316_s23  }
  0x1a   :  { %1305 = dma.done.wait [#allocation3], 3584  }
  0x1b   :  { %1306 = vsyncadd [#allocation3], 4294963712 }
  0x1c   :  { %1307 = dma.done.wait [#allocation6], 6272  }
  0x1d   :  { %1308 = vsyncadd [#allocation6], 4294961024  ;;  %v1156_v0 = vld [vmem:[#allocation5 + $0x78] sm:$0xff]   ;;  %v1160_v4 = vld [vmem:[#allocation5 + $0x70] sm:$0xff]   ;;  %vm615_vm0 = vcmask 130048  }
  0x1e   :  { %v1157_v1 = vld [vmem:[#allocation5 + $0xf8] sm:$0xff]   ;;  %996 = vmatprep.subr.bf16.mxu0 %v1156_v0  ;;  %v1161_v5 = vld [vmem:[#allocation5 + $0xf0] sm:$0xff]   ;;  %v1164_v8 = vld [vmem:[#allocation5 + $0x68] sm:$0xff]  }
  0x1f   :  { %v1158_v2 = vld [vmem:[#allocation5 + $0x38] sm:$0xff]   ;;  %1036 = vmatprep.subr.bf16.mxu1 %v1157_v1  ;;  %v1162_v6 = vld [vmem:[#allocation5 + $0x30] sm:$0xff]   ;;  %v1165_v9 = vld [vmem:[#allocation5 + $0xe8] sm:$0xff]  }
  0x20   :  { %v1159_v3 = vld [vmem:[#allocation5 + $0xb8] sm:$0xff]   ;;  %997 = vmatpush3.bf16.msra.mxu0 %v1158_v2  ;;  %v1163_v7 = vld [vmem:[#allocation5 + $0xb0] sm:$0xff]   ;;  %v1166_v10 = vld [vmem:[#allocation5 + $0x28] sm:$0xff]  }
  0x21   :  { %1037 = vmatpush3.bf16.msra.mxu1 %v1159_v3  ;;  %998 = vmatprep.subr.bf16.mxu0 %v1160_v4  ;;  %v1167_v11 = vld [vmem:[#allocation5 + $0xa8] sm:$0xff]   ;;  %v1168_v12 = vld [vmem:[#allocation5 + $0x60] sm:$0xff]   ;;  %v1172_v16 = vld [vmem:[#allocation5 + $0x58] sm:$0xff]  }
  0x22   :  { %1038 = vmatprep.subr.bf16.mxu1 %v1161_v5  ;;  %v1169_v13 = vld [vmem:[#allocation5 + $0xe0] sm:$0xff]   ;;  %v1173_v17 = vld [vmem:[#allocation5 + $0xd8] sm:$0xff]   ;;  %v1176_v20 = vld [vmem:[#allocation5 + $0x50] sm:$0xff]  }
  0x23   :  { %v1170_v14 = vld [vmem:[#allocation5 + $0x20] sm:$0xff]   ;;  %v1174_v18 = vld [vmem:[#allocation5 + $0x18] sm:$0xff]   ;;  %v1177_v21 = vld [vmem:[#allocation5 + $0xd0] sm:$0xff]  }
  0x24   :  { %999 = vmatpush3.bf16.msra.mxu0 %v1162_v6  ;;  %v1171_v15 = vld [vmem:[#allocation5 + $0xa0] sm:$0xff]   ;;  %v1175_v19 = vld [vmem:[#allocation5 + $0x98] sm:$0xff]   ;;  %v1178_v22 = vld [vmem:[#allocation5 + $0x10] sm:$0xff]  }
  0x25   :  { %1039 = vmatpush3.bf16.msra.mxu1 %v1163_v7  ;;  %1000 = vmatprep.subr.bf16.mxu0 %v1164_v8  ;;  %v1179_v23 = vld [vmem:[#allocation5 + $0x90] sm:$0xff]   ;;  %v1180_v24 = vld [vmem:[#allocation5 + $0x48] sm:$0xff]   ;;  %v1184_v28 = vld [vmem:[#allocation5 + $0x40] sm:$0xff]  }
  0x26   :  { %1040 = vmatprep.subr.bf16.mxu1 %v1165_v9  ;;  %v1181_v25 = vld [vmem:[#allocation5 + $0xc8] sm:$0xff]   ;;  %v1185_v29 = vld [vmem:[#allocation5 + $0xc0] sm:$0xff]   ;;  %v1194_v36 = vld [vmem:[#allocation5 + $0x178] sm:$0xff]  }
  0x27   :  { %v1182_v26 = vld [vmem:[#allocation5 + $0x8] sm:$0xff]   ;;  %v1186_v30 = vld [vmem:[#allocation5] sm:$0xff]   ;;  %v1195_v37 = vld [vmem:[#allocation5 + $0x138] sm:$0xff]  }
  0x28   :  { %1001 = vmatpush3.bf16.msra.mxu0 %v1166_v10  ;;  %v1183_v27 = vld [vmem:[#allocation5 + $0x88] sm:$0xff]   ;;  %v1187_v31 = vld [vmem:[#allocation5 + $0x80] sm:$0xff]   ;;  %v1196_v38 = vld [vmem:[#allocation5 + $0x170] sm:$0xff]  }
  0x29   :  { %1041 = vmatpush3.bf16.msra.mxu1 %v1167_v11  ;;  %1002 = vmatprep.subr.bf16.mxu0 %v1168_v12  ;;  %v1188_v32 = vld [vmem:[#allocation2] ss:$28 sps:$4 sm:$0xff]   ;;  %v1191_v34 = vld [vmem:[#allocation2 + $0x8] ss:$28 sps:$4 sm:$0xff]   ;;  %v1197_v39 = vld [vmem:[#allocation5 + $0x130] sm:$0xff]  }
  0x2a   :  { %1042 = vmatprep.subr.bf16.mxu1 %v1169_v13  ;;  %v1190_v33 = vld [vmem:[#allocation2 + $0x4] ss:$28 sps:$4 sm:$0xff]   ;;  %v1193_v35 = vld [vmem:[#allocation2 + $0xc] ss:$28 sps:$4 sm:$0xff]   ;;  %v1198_v40 = vld [vmem:[#allocation2 + $0x3c] ss:$28 sps:$4 sm:$0xff]  }
  0x2b   :  { %660 = vmatprep.mubr.bf16.mxu0 %v1190_v33  ;;  %725 = vmatprep.mubr.bf16.mxu1 %v1193_v35  ;;  %v1200_v41 = vld [vmem:[#allocation2 + $0x44] ss:$28 sps:$4 sm:$0xff]   ;;  %v1202_v42 = vld [vmem:[#allocation2 + $0x38] ss:$28 sps:$4 sm:$0xff]   ;;  %v1204_v44 = vld [vmem:[#allocation5 + $0x168] sm:$0xff]  }
  0x2c   :  { %1003 = vmatpush3.bf16.msra.mxu0 %v1170_v14  ;;  %v1203_v43 = vld [vmem:[#allocation2 + $0x40] ss:$28 sps:$4 sm:$0xff]   ;;  %v1205_v45 = vld [vmem:[#allocation5 + $0x128] sm:$0xff]   ;;  %v1208_v48 = vld [vmem:[#allocation2 + $0x74] ss:$28 sps:$4 sm:$0xff]  }
  0x2d   :  { %1043 = vmatpush3.bf16.msra.mxu1 %v1171_v15  ;;  %1004 = vmatprep.subr.bf16.mxu0 %v1172_v16  ;;  %v1206_v46 = vld [vmem:[#allocation5 + $0x160] sm:$0xff]   ;;  %v1210_v49 = vld [vmem:[#allocation2 + $0x7c] ss:$28 sps:$4 sm:$0xff]   ;;  %v1212_v50 = vld [vmem:[#allocation2 + $0x70] ss:$28 sps:$4 sm:$0xff]  }
  0x2e   :  { %1044 = vmatprep.subr.bf16.mxu1 %v1173_v17  ;;  %v1207_v47 = vld [vmem:[#allocation5 + $0x120] sm:$0xff]   ;;  %v1214_v51 = vld [vmem:[#allocation5 + $0x158] sm:$0xff]   ;;  %v1216_v54 = vld [vmem:[#allocation5 + $0x150] sm:$0xff]  }
  0x2f   :  { %v1213_v52 = vld [vmem:[#allocation2 + $0x78] ss:$28 sps:$4 sm:$0xff]   ;;  %v1218_v55 = vld [vmem:[#allocation2 + $0xac] ss:$28 sps:$4 sm:$0xff]   ;;  %v1226_v62 = vld [vmem:[#allocation5 + $0x140] sm:$0xff]  }
  0x30   :  { %1005 = vmatpush3.bf16.msra.mxu0 %v1174_v18  ;;  %v1215_v53 = vld [vmem:[#allocation5 + $0x118] sm:$0xff]   ;;  %v1220_v56 = vld [vmem:[#allocation2 + $0xb4] ss:$28 sps:$4 sm:$0xff]   ;;  %v1224_v58 = vld [vmem:[#allocation5 + $0x148] sm:$0xff]  }
  0x31   :  { %1045 = vmatpush3.bf16.msra.mxu1 %v1175_v19  ;;  %1006 = vmatprep.subr.bf16.mxu0 %v1176_v20  ;;  %v1217_v57 = vld [vmem:[#allocation5 + $0x110] sm:$0xff]   ;;  %v1222_v59 = vld [vmem:[#allocation2 + $0xa8] ss:$28 sps:$4 sm:$0xff]   ;;  %v1233_v0 = vld [vmem:[#allocation2 + $0xbc] ss:$28 sps:$4 sm:$0xff]  }
  0x32   :  { %1046 = vmatprep.subr.bf16.mxu1 %v1177_v21  ;;  %v1223_v60 = vld [vmem:[#allocation2 + $0xb0] ss:$28 sps:$4 sm:$0xff]   ;;  %v1227_v1 = vld [vmem:[#allocation5 + $0x100] sm:$0xff]   ;;  %v1231_v4 = vld [vmem:[#allocation2 + $0xb8] ss:$28 sps:$4 sm:$0xff]  }
  0x33   :  { %v1225_v61 = vld [vmem:[#allocation5 + $0x108] sm:$0xff]   ;;  %v1230_v63 = vld [vmem:[#allocation2 + $0x14] ss:$28 sps:$4 sm:$0xff]   ;;  %v1234_v3 = vld [vmem:[#allocation5 + $0x180] sm:$0xff]  }
  0x34   :  { %1007 = vmatpush3.bf16.msra.mxu0 %v1178_v22  ;;  %v1228_v2 = vld [vmem:[#allocation2 + $0x10] ss:$28 sps:$4 sm:$0xff]   ;;  %v1237_v6 = vld [vmem:[#allocation2 + $0x18] ss:$28 sps:$4 sm:$0xff]   ;;  %v1238_v7 = vld [vmem:[#allocation2 + $0x48] ss:$28 sps:$4 sm:$0xff]  }
  0x35   :  { %1047 = vmatpush3.bf16.msra.mxu1 %v1179_v23  ;;  %1008 = vmatprep.subr.bf16.mxu0 %v1180_v24  ;;  %v1235_v5 = vld [vmem:[#allocation2 + $0x4c] ss:$28 sps:$4 sm:$0xff]   ;;  %v1240_v9 = vld [vmem:[#allocation2 + $0x84] ss:$28 sps:$4 sm:$0xff]  }
  0x36   :  { %1048 = vmatprep.subr.bf16.mxu1 %v1181_v25  ;;  %v1239_v8 = vld [vmem:[#allocation2 + $0x50] ss:$28 sps:$4 sm:$0xff]   ;;  %v1242_v10 = vld [vmem:[#allocation2 + $0x88] ss:$28 sps:$4 sm:$0xff]   ;;  %v1243_v11 = vld [vmem:[#allocation2 + $0x80] ss:$28 sps:$4 sm:$0xff]  }
  0x37   :  { %v1244_v12 = vld [vmem:[#allocation2 + $0xc0] ss:$28 sps:$4 sm:$0xff]  }
  0x38   :  { %1009 = vmatpush3.bf16.msra.mxu0 %v1182_v26 }
  0x39   :  { %1049 = vmatpush3.bf16.msra.mxu1 %v1183_v27  ;;  %1010 = vmatprep.subr.bf16.mxu0 %v1184_v28 }
  0x3a   :  { %1050 = vmatprep.subr.bf16.mxu1 %v1185_v29 }
  0x3c   :  { %1011 = vmatpush3.bf16.msra.mxu0 %v1186_v30 }
  0x3d   :  { %1051 = vmatpush3.bf16.msra.mxu1 %v1187_v31  ;;  %1076 = vmatprep.subr.bf16.mxu0 %v1194_v36 }
  0x3e   :  { %1131 = vmatprep.subr.bf16.mxu1 %v1194_v36 }
  0x3f   :  { %661 = vmatmul.mubr.bf16.vlgmr.msra.gmra.mxu0 %v1188_v32 }
  0x40   :  { %726 = vmatmul.mubr.bf16.vlgmr.msra.gmra.mxu1 %v1191_v34  ;;  %1077 = vmatpush3.bf16.msra.mxu0 %v1195_v37 }
  0x41   :  { %1139 = vmatpush3.bf16.msra.mxu1 %v1195_v37  ;;  %1078 = vmatprep.subr.bf16.mxu0 %v1196_v38 }
  0x42   :  { %1132 = vmatprep.subr.bf16.mxu1 %v1196_v38  ;;  %668 = vmatprep.mubr.bf16.mxu0 %v1198_v40 }
  0x43   :  { %733 = vmatprep.mubr.bf16.mxu1 %v1200_v41 }
  0x44   :  { %1079 = vmatpush3.bf16.msra.mxu0 %v1197_v39 }
  0x45   :  { %1140 = vmatpush3.bf16.msra.mxu1 %v1197_v39  ;;  %1080 = vmatprep.subr.bf16.mxu0 %v1204_v44 }
  0x46   :  { %1133 = vmatprep.subr.bf16.mxu1 %v1204_v44 }
  0x47   :  { %669 = vmatmul.mubr.bf16.gmra.mxu0 %v1202_v42 }
  0x48   :  { %734 = vmatmul.mubr.bf16.gmra.mxu1 %v1203_v43  ;;  %1081 = vmatpush3.bf16.msra.mxu0 %v1205_v45 }
  0x49   :  { %1141 = vmatpush3.bf16.msra.mxu1 %v1205_v45  ;;  %1082 = vmatprep.subr.bf16.mxu0 %v1206_v46 }
  0x4a   :  { %1134 = vmatprep.subr.bf16.mxu1 %v1206_v46  ;;  %676 = vmatprep.mubr.bf16.mxu0 %v1208_v48 }
  0x4b   :  { %741 = vmatprep.mubr.bf16.mxu1 %v1210_v49 }
  0x4c   :  { %1083 = vmatpush3.bf16.msra.mxu0 %v1207_v47 }
  0x4d   :  { %1142 = vmatpush3.bf16.msra.mxu1 %v1207_v47  ;;  %1084 = vmatprep.subr.bf16.mxu0 %v1214_v51  ;;  %v1357_v47 = vld [vmem:[%s1374_s2] ss:$0 sm:$0xff]  ;;  %s1317_s2 = smov [#allocation7]  }
  0x4e   :  { %1135 = vmatprep.subr.bf16.mxu1 %v1214_v51  ;;  %s901_s26 = sshll.u32 %s1317_s2, 4  ;;  %s902_s26 = int_to_ptr.vmem [resolvable:$true] %s901_s26 }
  0x4f   :  { %677 = vmatmul.mubr.bf16.gmra.mxu0 %v1212_v50  ;;  %s1285_s27 = scalar_lea.vmem %s902_s26, 1024  ;;  %p1290_p11 = scmp.lt.s32.totalorder %s902_s26, %s902_s26 }
  0x50   :  { %742 = vmatmul.mubr.bf16.gmra.mxu1 %v1213_v52  ;;  %1085 = vmatpush3.bf16.msra.mxu0 %v1215_v53  ;;  %p1286_p10 = scmp.ne.s32.totalorder %s902_s26, %s1285_s27  ;;  %p1291_p12 = scmp.lt.s32.totalorder %s1285_s27, %s1285_s27 }
  0x51   :  { %684 = vmatprep.mubr.bf16.mxu0 %v1218_v55  ;;  %1143 = vmatpush3.bf16.msra.mxu1 %v1215_v53 }
  0x52   :  { %1086 = vmatprep.subr.bf16.mxu0 %v1216_v54  ;;  %1136 = vmatprep.subr.bf16.mxu1 %v1216_v54  ;;  %p1292_p13 = por %p1291_p12, %p1290_p11 }
  0x53   :  { %749 = vmatprep.mubr.bf16.mxu1 %v1220_v56 }
  0x54   :  { %1087 = vmatpush3.bf16.msra.mxu0 %v1217_v57  ;;  %p1293_p0 = pnand %p1292_p13, %p1286_p10 }
  0x55   :  { %1144 = vmatpush3.bf16.msra.mxu1 %v1217_v57  ;;  %1088 = vmatprep.subr.bf16.mxu0 %v1224_v58 }
  0x56   :  { %1137 = vmatprep.subr.bf16.mxu1 %v1224_v58 }
  0x57   :  { %685 = vmatmul.mubr.bf16.gmra.mxu0 %v1222_v59 }
  0x58   :  { %750 = vmatmul.mubr.bf16.gmra.mxu1 %v1223_v60  ;;  %790 = vmatprep.mubr.bf16.mxu0 %v1230_v63 }
  0x59   :  { %1089 = vmatpush3.bf16.msra.mxu0 %v1225_v61  ;;  %1145 = vmatpush3.bf16.msra.mxu1 %v1225_v61 }
  0x5a   :  { %1090 = vmatprep.subr.bf16.mxu0 %v1226_v62  ;;  %1138 = vmatprep.subr.bf16.mxu1 %v1226_v62 }
  0x5b   :  { %814 = vmatprep.mubr.bf16.mxu1 %v1233_v0 }
  0x5d   :  { %1091 = vmatpush3.bf16.msra.mxu0 %v1227_v1  ;;  %1146 = vmatpush3.bf16.msra.mxu1 %v1227_v1 }
  0x5e   :  { %1121 = vmatprep.subr.bf16.mxu1 %v1234_v3 }
  0x60   :  { %791 = vmatmul.mubr.bf16.vlgmr.msra.gmra.mxu0 %v1228_v2  ;;  %815 = vmatmul.mubr.bf16.vlgmr.msra.gmra.mxu1 %v1231_v4 }
  0x61   :  { %798 = vmatprep.mubr.bf16.mxu0 %v1235_v5  ;;  %1122 = vmatpush3.bf16.msra.mxu1 %v1234_v3 }
  0x62   :  { %1123 = vmatprep.mubr.msk.bf16.mxu1 %vm615_vm0, %v1237_v6 }
  0x68   :  { %799 = vmatmul.mubr.bf16.gmra.mxu0 %v1238_v7  ;;  %1124 = vmatmul.mubr.msk.bf16.vlgmr.msra.gmra.mxu1 %vm615_vm0, %v1239_v8 }
  0x69   :  { %806 = vmatprep.mubr.bf16.mxu0 %v1240_v9  ;;  %1127 = vmatprep.mubr.msk.bf16.mxu1 %vm615_vm0, %v1242_v10 }
  0x70   :  { %807 = vmatmul.mubr.bf16.gmra.mxu0 %v1243_v11  ;;  %1128 = vmatmul.mubr.msk.bf16.gmra.mxu1 %vm615_vm0, %v1244_v12 }
  0xff   :  { %v1012_v13 = vpop.f32.mrf.mxu0 }
 0x100   :  { %v1052_v14 = vpop.f32.mrf.mxu1 }
 0x101   :  { %v1013_v15 = vpop.f32.mrf.mxu0 }
 0x102   :  { %v1053_v16 = vpop.f32.mrf.mxu1  ;;  %v1014_v45 = vadd.f32 %v1013_v15, %v1012_v13 }
 0x103   :  { %v1015_v17 = vpop.f32.mrf.mxu0  ;;  %v1054_v53 = vadd.f32 %v1053_v16, %v1052_v14 }
 0x104   :  { %v1055_v18 = vpop.f32.mrf.mxu1  ;;  %v663_v52 = vadd.f32 %v1014_v45, %v1357_v47 }
 0x105   :  { %v1016_v19 = vpop.f32.mrf.mxu0 }
 0x106   :  { %v1056_v20 = vpop.f32.mrf.mxu1  ;;  %v1017_v54 = vadd.f32 %v1016_v19, %v1015_v17  ;;  %v728_v0 = vadd.f32 %v1054_v53, %v663_v52 }
 0x107   :  { %v1018_v21 = vpop.f32.mrf.mxu0  ;;  %v1057_v3 = vadd.f32 %v1056_v20, %v1055_v18 }
 0x108   :  { %v1058_v22 = vpop.f32.mrf.mxu1  ;;  %v666_v1 = vadd.f32 %v1017_v54, %v1357_v47 }
 0x109   :  { %v1019_v23 = vpop.f32.mrf.mxu0 }
 0x10a   :  { %v1059_v24 = vpop.f32.mrf.mxu1  ;;  %v1020_v50 = vadd.f32 %v1019_v23, %v1018_v21  ;;  %v731_v17 = vadd.f32 %v1057_v3, %v666_v1 }
 0x10b   :  { %v1021_v25 = vpop.f32.mrf.mxu0  ;;  %v1060_v62 = vadd.f32 %v1059_v24, %v1058_v22 }
 0x10c   :  { %v1061_v26 = vpop.f32.mrf.mxu1  ;;  %v671_v61 = vadd.f32 %v1020_v50, %v1357_v47 }
 0x10d   :  { %v1022_v27 = vpop.f32.mrf.mxu0 }
 0x10e   :  { %v1062_v28 = vpop.f32.mrf.mxu1  ;;  %v1023_v56 = vadd.f32 %v1022_v27, %v1021_v25  ;;  %v736_v12 = vadd.f32 %v1060_v62, %v671_v61 }
 0x10f   :  { %v1024_v29 = vpop.f32.mrf.mxu0  ;;  %v1063_v13 = vadd.f32 %v1062_v28, %v1061_v26 }
 0x110   :  { %v1064_v30 = vpop.f32.mrf.mxu1  ;;  %v674_v4 = vadd.f32 %v1023_v56, %v1357_v47 }
 0x111   :  { %v1025_v31 = vpop.f32.mrf.mxu0 }
 0x112   :  { %v1065_v32 = vpop.f32.mrf.mxu1  ;;  %v1026_v14 = vadd.f32 %v1025_v31, %v1024_v29  ;;  %v739_v18 = vadd.f32 %v1063_v13, %v674_v4 }
 0x113   :  { %v1027_v33 = vpop.f32.mrf.mxu0  ;;  %v1066_v24 = vadd.f32 %v1065_v32, %v1064_v30 }
 0x114   :  { %v1350_v34 = vpop.f32.mrf.mxu1 }
 0x115   :  { %v1028_v35 = vpop.f32.mrf.mxu0 }
 0x116   :  { %v1352_v36 = vpop.f32.mrf.mxu1  ;;  %v1029_v26 = vadd.f32 %v1028_v35, %v1027_v33 }
 0x117   :  { %v1030_v37 = vpop.f32.mrf.mxu0 }
 0x118   :  { %v1070_v38 = vpop.f32.mrf.mxu1  ;;  %v682_v52 = vadd.f32 %v1029_v26, %v1357_v47 }
 0x119   :  { %v1031_v39 = vpop.f32.mrf.mxu0 }
 0x11a   :  { %v1071_v40 = vpop.f32.mrf.mxu1  ;;  %v1032_v58 = vadd.f32 %v1031_v39, %v1030_v37  ;;  %v679_v39 = vadd.f32 %v1026_v14, %v1357_v47 }
 0x11b   :  { %v1033_v41 = vpop.f32.mrf.mxu0  ;;  %v1072_v5 = vadd.f32 %v1071_v40, %v1070_v38 }
 0x11c   :  { %v1073_v42 = vpop.f32.mrf.mxu1  ;;  %v687_v7 = vadd.f32 %v1032_v58, %v1357_v47 }
 0x11d   :  { %v1034_v43 = vpop.f32.mrf.mxu0 }
 0x11e   :  { %v1074_v44 = vpop.f32.mrf.mxu1  ;;  %v1035_v8 = vadd.f32 %v1034_v43, %v1033_v41  ;;  %v752_v25 = vadd.f32 %v1072_v5, %v687_v7 }
 0x11f   :  { %v1075_v40 = vadd.f32 %v1074_v44, %v1073_v42  ;;  %v1069_v44 = vadd.f32 %v1352_v36, %v1350_v34 }
 0x120   :  { %v1092_v46 = vpop.f32.mrf.mxu0  ;;  %v1110_v48 = vpop.f32.mrf.mxu1  ;;  %v690_v27 = vadd.f32 %v1035_v8, %v1357_v47 }
 0x122   :  { %v1093_v49 = vpop.f32.mrf.mxu0  ;;  %v1111_v51 = vpop.f32.mrf.mxu1  ;;  %v755_v32 = vadd.f32 %v1075_v40, %v690_v27 }
 0x123   :  { %v1094_v59 = vadd.f32 %v1093_v49, %v1092_v46  ;;  %v1112_v19 = vadd.f32 %v1111_v51, %v1110_v48  ;;  %v744_v51 = vadd.f32 %v1066_v24, %v679_v39 }
 0x124   :  { %v1095_v55 = vpop.f32.mrf.mxu0  ;;  %v1113_v57 = vpop.f32.mrf.mxu1 }
 0x125   :  { %v793_v11 = vadd.f32 %v1094_v59, %v728_v0  ;;  %v817_v46 = vadd.f32 %v1112_v19, %v752_v25  ;;  %v747_v59 = vadd.f32 %v1069_v44, %v682_v52 }
 0x126   :  { %v1096_v60 = vpop.f32.mrf.mxu0  ;;  %v1114_v63 = vpop.f32.mrf.mxu1 }
 0x127   :  { %v1097_v9 = vadd.f32 %v1096_v60, %v1095_v55  ;;  %v1115_v41 = vadd.f32 %v1114_v63, %v1113_v57 }
 0x128   :  { %v1098_v2 = vpop.f32.mrf.mxu0  ;;  %v1125_v6 = vpop.f32.mrf.mxu1 }
 0x129   :  { %v796_v38 = vadd.f32 %v1097_v9, %v731_v17  ;;  %v820_v42 = vadd.f32 %v1115_v41, %v755_v32 }
 0x12a   :  { %v1099_v10 = vpop.f32.mrf.mxu0  ;;  %v857_v16 = vpop.f32.mrf.mxu1 }
 0x12b   :  { %v1100_v15 = vadd.f32 %v1099_v10, %v1098_v2  ;;  %v858_v21 = vadd.f32 %v857_v16, %v793_v11 }
 0x12c   :  { %v1101_v22 = vpop.f32.mrf.mxu0  ;;  %v1126_v23 = vpop.f32.mrf.mxu1 }
 0x12d   :  { %v801_v20 = vadd.f32 %v1100_v15, %v736_v12  ;;  %888 = vst [vmem:[#allocation7] sm:$0xff] %v858_v21 }
 0x12e   :  { %v1102_v37 = vpop.f32.mrf.mxu0  ;;  %v860_v31 = vpop.f32.mrf.mxu1 }
 0x12f   :  { %v866_v28 = vadd.f32 %v1125_v6, %v801_v20  ;;  %v1103_v29 = vadd.f32 %v1102_v37, %v1101_v22  ;;  %v861_v43 = vadd.f32 %v860_v31, %v796_v38 }
 0x130   :  { %v1104_v45 = vpop.f32.mrf.mxu0  ;;  %v1129_v30 = vpop.f32.mrf.mxu1 }
 0x131   :  { %890 = vst [vmem:[#allocation7 + $0x10] sm:$0xff] %v866_v28  ;;  %v804_v48 = vadd.f32 %v1103_v29, %v739_v18  ;;  %889 = vst [vmem:[#allocation7 + $0x8] sm:$0xff] %v861_v43  ;;  %v882_v49 = vadd.f32 %v1129_v30, %v817_v46 }
 0x132   :  { %v1105_v50 = vpop.f32.mrf.mxu0  ;;  %v873_v35 = vpop.f32.mrf.mxu1 }
 0x133   :  { %v869_v53 = vadd.f32 %v1126_v23, %v804_v48  ;;  %v1106_v33 = vadd.f32 %v1105_v50, %v1104_v45  ;;  %894 = vst [vmem:[#allocation7 + $0x30] sm:$0xff] %v882_v49 }
 0x134   :  { %v1107_v54 = vpop.f32.mrf.mxu0  ;;  %v1130_v56 = vpop.f32.mrf.mxu1 }
 0x135   :  { %891 = vst [vmem:[#allocation7 + $0x18] sm:$0xff] %v869_v53  ;;  %v809_v55 = vadd.f32 %v1106_v33, %v744_v51  ;;  %v885_v57 = vadd.f32 %v1130_v56, %v820_v42 }
 0x136   :  { %v1108_v58 = vpop.f32.mrf.mxu0  ;;  %v876_v62 = vpop.f32.mrf.mxu1 }
 0x137   :  { %v874_v60 = vadd.f32 %v873_v35, %v809_v55  ;;  %v1109_v61 = vadd.f32 %v1108_v58, %v1107_v54  ;;  %895 = vst [vmem:[#allocation7 + $0x38] sm:$0xff] %v885_v57 }
 0x139   :  { %892 = vst [vmem:[#allocation7 + $0x20] sm:$0xff] %v874_v60  ;;  %v812_v47 = vadd.f32 %v1109_v61, %v747_v59 }
 0x13b   :  { %v877_v63 = vadd.f32 %v876_v62, %v812_v47 }
 0x13d   :  { %893 = vst [vmem:[#allocation7 + $0x28] sm:$0xff] %v877_v63 }
 0x13e   :  { %1296 = shalt.err (!%p1293_p0)
}
 0x13f   :  { %s1318_s28 = smov 128   ;;  %s1319_s29 = smov 8  }
 0x140   :  { %907 = dma.vmem_to_hbm [thread:$0]  %s902_s26, 1024, %s1375_s3, [#allocation4], %s1318_s28, %s1318_s28, %s1319_s29  }
 0x141   :  { %1309 = dma.done.wait [#allocation4], 1024  }
 0x142   :  { %1310 = vsyncadd [#allocation4], 4294966272 }
 0x143   :  { %911 = vsyncpa [#allocation3], 1 }
 0x144   :  { %912 = vsyncpa [#allocation6], 1 }
 0x145   :  { %913 = vsyncpa [#allocation4], 1 }

</bundles_post_ra>
